<compile_context>
chip_gen: v7x
topology: tpu7x:2x2x1
jax: 0.10.0
libtpu: 0.0.40
codegen_flags: <defaults>
</compile_context>

<pallas_src>
import functools
import math

import jax
import jax.numpy as jnp
from jax import lax
from jax.experimental import pallas as pl
from jax.experimental.pallas import tpu as pltpu


def _round_up(x, m):
    return ((x + m - 1) // m) * m


def _log_softmax(z):
    """Numerically stable log_softmax over axis=1 (f32 in, f32 out).

    Returns (log_softmax, exp(z - max), row_sum) so callers can reuse the
    exponentials (teacher softmax needs no second exp pass).
    """
    m = jnp.max(z, axis=1, keepdims=True)
    e = jnp.exp(z - m)
    s = jnp.sum(e, axis=1, keepdims=True)
    return z - m - jnp.log(s), e, s


# ----------------------------------------------------------------------------
# Fused kernel: teacher linear forward (W streamed over D) + base CE + KD term.
# Grid: (batch_tiles [parallel], D_chunks [arbitrary]).
# Per-tile partial sums are written to (n_tiles, 1, 1) outputs; the final
# scalar combination happens in JAX.
# ----------------------------------------------------------------------------
def fused_distill_kernel(x_ref, w_ref, b_ref, cls_ref, kd_ref, lab_ref,
                         ce_ref, dist_ref, t_acc, *, tau, n, tile_n, mode):
    i = pl.program_id(0)          # batch tile
    d = pl.program_id(1)          # D-contraction step

    # ---- first D step: init teacher accumulator + base CE on class token ----
    # (CE only depends on the resident cls/labels blocks, so doing it here lets
    #  it overlap with the remaining W-chunk DMAs.)
    @pl.when(d == 0)
    def _first():
        t_acc[...] = jnp.zeros_like(t_acc)
        cls = cls_ref[...].astype(jnp.float32)
        col = lax.broadcasted_iota(jnp.int32, cls.shape, 1)
        row_valid = (lax.broadcasted_iota(jnp.int32, cls.shape, 0)
                     + i * tile_n) < n
        log_p, _, _ = _log_softmax(cls)
        sel = jnp.where(row_valid & (col == lab_ref[...]), log_p, 0.0)
        ce_ref[...] = (-jnp.sum(sel, keepdims=True)).reshape(1, 1, 1)

    # ---- teacher linear forward: stream W over D, accumulate on the MXU ----
    t_acc[...] += jnp.dot(x_ref[...], w_ref[...],
                          preferred_element_type=jnp.float32)

    # ---- last D step: teacher logits complete -> distillation term ----------
    @pl.when(d == pl.num_programs(1) - 1)
    def _last():
        teacher = t_acc[...] + b_ref[...].astype(jnp.float32)
        kd = kd_ref[...].astype(jnp.float32)
        col = lax.broadcasted_iota(jnp.int32, kd.shape, 1)
        row_valid = (lax.broadcasted_iota(jnp.int32, kd.shape, 0)
                     + i * tile_n) < n

        if mode == "soft":
            inv_tau = 1.0 / tau
            log_s, _, _ = _log_softmax(kd * inv_tau)
            log_t, e_t, s_t = _log_softmax(teacher * inv_tau)
            # reuse exp(); divide -> EUP reciprocal (free slot vs VALU)
            p_t = e_t * pl.reciprocal(s_t, approx=True)
            kl = jnp.where(row_valid, p_t * (log_t - log_s), 0.0)
            dist_ref[...] = jnp.sum(kl, keepdims=True).reshape(1, 1, 1)
        else:  # "hard": cross_entropy(outputs_kd, teacher.argmax(dim=1))
            t_max = jnp.max(teacher, axis=1, keepdims=True)
            # first index attaining the max (matches torch.argmax tie-break)
            first_idx = jnp.min(
                jnp.where(teacher == t_max, col, teacher.shape[1]),
                axis=1, keepdims=True)
            log_q, _, _ = _log_softmax(kd)
            sel = jnp.where(row_valid & (col == first_idx), log_q, 0.0)
            dist_ref[...] = (-jnp.sum(sel, keepdims=True)).reshape(1, 1, 1)


# ----------------------------------------------------------------------------
# CE-only kernel for distillation_type == 'none' (skips teacher + KD work).
# ----------------------------------------------------------------------------
def ce_only_kernel(cls_ref, lab_ref, ce_ref, *, n, tile_n):
    i = pl.program_id(0)
    cls = cls_ref[...].astype(jnp.float32)
    col = lax.broadcasted_iota(jnp.int32, cls.shape, 1)
    row_valid = (lax.broadcasted_iota(jnp.int32, cls.shape, 0)
                 + i * tile_n) < n
    log_p, _, _ = _log_softmax(cls)
    sel = jnp.where(row_valid & (col == lab_ref[...]), log_p, 0.0)
    ce_ref[...] = (-jnp.sum(sel, keepdims=True)).reshape(1, 1, 1)


def _vmem_limit_bytes(tile_n, tile_d, k, x_dtype, w_dtype, logit_dtype):
    """Explicit scoped-VMEM request (default is 16 MiB on v5e, 32 MiB v6e/v7x)."""
    k_lanes = max(_round_up(k, 128), 128)
    sz = lambda dt: jnp.dtype(dt).itemsize
    est = (2 * tile_n * tile_d * sz(x_dtype)            # x (double-buffered)
           + 2 * tile_d * k_lanes * sz(w_dtype)         # W chunk
           + 2 * 1 * k_lanes * sz(w_dtype)              # bias
           + 2 * 2 * tile_n * k_lanes * sz(logit_dtype)  # cls + kd
           + 2 * tile_n * 128 * 4                       # labels (lane-padded)
           + tile_n * k_lanes * 4                       # teacher-logit scratch
           + (2 << 20))                                 # outputs + headroom
    # Cap at 64 MiB so the request also fits v7x physical VMEM.
    return int(min(64 * 1024 * 1024, max(32 * 1024 * 1024, 2 * est)))


# ----------------------------------------------------------------------------
# Wrapper mirroring DistillationLoss.forward (single jit, single pallas_call).
# ----------------------------------------------------------------------------
@functools.partial(jax.jit,
                   static_argnames=("distillation_type", "alpha", "tau",
                                    "tile_n", "tile_d"))
def distillation_loss(inputs, outputs, labels, teacher_w, teacher_b, *,
                      distillation_type="soft", alpha=0.5, tau=1.0,
                      tile_n=None, tile_d=None):
    assert distillation_type in ("none", "soft", "hard")
    if isinstance(outputs, (tuple, list)):
        student_cls, student_kd = outputs
    else:
        student_cls, student_kd = outputs, None

    N, K = student_cls.shape
    if tile_n is None:
        # 256 rows amortizes per-grid-step overhead and the MXU RHS push while
        # still fitting the explicit VMEM budget on every generation.
        tile_n = min(_round_up(N, 8), 256)
    n_tiles = pl.cdiv(N, tile_n)
    labels_2d = labels.reshape(N, 1).astype(jnp.int32)

    if distillation_type == "none":
        ce_parts = pl.pallas_call(
            functools.partial(ce_only_kernel, n=N, tile_n=tile_n),
            out_shape=jax.ShapeDtypeStruct((n_tiles, 1, 1), jnp.float32),
            grid_spec=pltpu.PrefetchScalarGridSpec(
                num_scalar_prefetch=0,
                grid=(n_tiles,),
                in_specs=[
                    pl.BlockSpec((tile_n, K), lambda i: (i, 0)),
                    pl.BlockSpec((tile_n, 1), lambda i: (i, 0)),
                ],
                out_specs=pl.BlockSpec((1, 1, 1), lambda i: (i, 0, 0))),
            compiler_params=pltpu.CompilerParams(
                dimension_semantics=("parallel",),
                vmem_limit_bytes=32 * 1024 * 1024),
        )(student_cls, labels_2d)
        return jnp.sum(ce_parts) / N

    if student_kd is None:
        raise ValueError("distillation requires (class_token, dist_token) "
                         "outputs")

    # Teacher = deterministic linear classifier stand-in; flatten NCHW inputs.
    D = math.prod(inputs.shape[1:])
    x2d = inputs.reshape(N, D)                 # native dtype, no copy/pad
    w2d = teacher_w.reshape(D, K)
    b2d = teacher_b.reshape(1, K)

    if tile_d is None:
        if D % 512 == 0:
            tile_d = 512
        elif D % 256 == 0:
            tile_d = 256
        elif D % 128 == 0:
            tile_d = 128
        else:
            tile_d = D   # TODO(synk): pad/mask D when not a multiple of 128
    assert D % tile_d == 0, "tile_d must divide the flattened teacher dim"
    d_steps = D // tile_d

    vmem_limit = _vmem_limit_bytes(tile_n, tile_d, K, x2d.dtype, w2d.dtype,
                                   student_cls.dtype)

    ce_parts, dist_parts = pl.pallas_call(
        functools.partial(fused_distill_kernel, tau=float(tau), n=N,
                          tile_n=tile_n, mode=distillation_type),
        out_shape=(jax.ShapeDtypeStruct((n_tiles, 1, 1), jnp.float32),
                   jax.ShapeDtypeStruct((n_tiles, 1, 1), jnp.float32)),
        grid_spec=pltpu.PrefetchScalarGridSpec(
            num_scalar_prefetch=0,
            grid=(n_tiles, d_steps),
            in_specs=[
                pl.BlockSpec((tile_n, tile_d), lambda i, d: (i, d)),  # x chunk
                pl.BlockSpec((tile_d, K), lambda i, d: (d, 0)),       # W chunk
                pl.BlockSpec((1, K), lambda i, d: (0, 0)),            # bias
                pl.BlockSpec((tile_n, K), lambda i, d: (i, 0)),       # cls
                pl.BlockSpec((tile_n, K), lambda i, d: (i, 0)),       # kd
                pl.BlockSpec((tile_n, 1), lambda i, d: (i, 0)),       # labels
            ],
            out_specs=[
                pl.BlockSpec((1, 1, 1), lambda i, d: (i, 0, 0)),      # CE part
                pl.BlockSpec((1, 1, 1), lambda i, d: (i, 0, 0)),      # KD part
            ],
            scratch_shapes=[pltpu.VMEM((tile_n, K), jnp.float32)]),   # teacher
        compiler_params=pltpu.CompilerParams(
            dimension_semantics=("parallel", "arbitrary"),
            vmem_limit_bytes=vmem_limit),
    )(x2d, w2d, b2d, student_cls, student_kd, labels_2d)

    base = jnp.sum(ce_parts) / N
    if distillation_type == "soft":
        dist = (jnp.sum(dist_parts) / N) * (tau * tau)
    else:
        dist = jnp.sum(dist_parts) / N
    return base * (1.0 - alpha) + dist * alpha


# ----------------------------------------------------------------------------
# Pure-JAX reference for verification
# ----------------------------------------------------------------------------
def reference_loss(inputs, outputs, labels, w, b, *, distillation_type,
                   alpha, tau):
    cls, kd = outputs
    n = cls.shape[0]
    log_p = jax.nn.log_softmax(cls, axis=1)
    base = -jnp.mean(log_p[jnp.arange(n), labels])
    if distillation_type == "none":
        return base
    x_flat = inputs.reshape(n, -1)
    teacher = x_flat @ w + b
    if distillation_type == "soft":
        log_s = jax.nn.log_softmax(kd / tau, axis=1)
        log_t = jax.nn.log_softmax(teacher / tau, axis=1)
        kl = jnp.sum(jnp.exp(log_t) * (log_t - log_s)) / n
        dist = kl * tau * tau
    else:  # hard
        hard_t = jnp.argmax(teacher, axis=1)
        log_q = jax.nn.log_softmax(kd, axis=1)
        dist = -jnp.mean(log_q[jnp.arange(n), hard_t])
    return base * (1.0 - alpha) + dist * alpha


if __name__ == "__main__":
    key = jax.random.PRNGKey(0)
    k_x, k_w, k_b, k_cls, k_kd, k_lab = jax.random.split(key, 6)

    # Small shapes consistent with the module's forward (NCHW images).
    N, C, H, W = 8, 4, 16, 16
    K = 32
    D = C * H * W          # 1024 -> exercises the D-streaming path (2 chunks)
    alpha, tau = 0.5, 2.0

    x = jax.random.normal(k_x, (N, C, H, W), dtype=jnp.float32)

    # Deterministic teacher parameters (simple linear classifier stand-in)
    w_teacher = jax.random.normal(k_w, (D, K), dtype=jnp.float32) * 0.02
    b_teacher = jax.random.normal(k_b, (K,), dtype=jnp.float32) * 0.02

    # Student outputs: (class-token logits, distillation-token logits)
    student_cls = jax.random.normal(k_cls, (N, K), dtype=jnp.float32)
    student_kd = jax.random.normal(k_kd, (N, K), dtype=jnp.float32)
    labels = jax.random.randint(k_lab, (N,), 0, K, dtype=jnp.int32)
    outputs = (student_cls, student_kd)

    for mode in ("soft", "hard", "none"):
        loss = distillation_loss(x, outputs, labels, w_teacher, b_teacher,
                                 distillation_type=mode, alpha=alpha, tau=tau)
        loss = jax.block_until_ready(loss)
        ref = reference_loss(x, outputs, labels, w_teacher, b_teacher,
                             distillation_type=mode, alpha=alpha, tau=tau)
        # soft mode uses the approximate EUP reciprocal for the teacher softmax
        # denominator -> slightly looser tolerance there.
        rtol = 1e-3 if mode == "soft" else 1e-5
        assert jnp.allclose(loss, ref, rtol=rtol, atol=1e-5), (mode, loss, ref)

    print("KERNEL_OK")
</pallas_src>

<mosaic_0001>
module attributes {stable_mosaic.version = 11 : i64} {
  func.func @fused_distill_kernel(%arg0: i32, %arg1: i32, %arg2: memref<8x512xf32, #tpu.memory_space<vmem>>, %arg3: memref<512x32xf32, #tpu.memory_space<vmem>>, %arg4: memref<1x32xf32, #tpu.memory_space<vmem>>, %arg5: memref<8x32xf32, #tpu.memory_space<vmem>>, %arg6: memref<8x32xf32, #tpu.memory_space<vmem>>, %arg7: memref<8x1xi32, #tpu.memory_space<vmem>>, %arg8: memref<1x1x1xf32, #tpu.memory_space<vmem>>, %arg9: memref<1x1x1xf32, #tpu.memory_space<vmem>>, %arg10: memref<8x32xf32, #tpu.memory_space<vmem>>) attributes {dimension_semantics = [#tpu.dimension_semantics<parallel>, #tpu.dimension_semantics<arbitrary>], iteration_bounds = array<i64: 1, 2>, scalar_prefetch = 0 : i64, scratch_operands = 1 : i64, tpu.core_type = #tpu.core_type<tc>, window_params = [{transform_indices = @transform_0, window_bounds = array<i64: 8, 512>}, {transform_indices = @transform_1, window_bounds = array<i64: 512, 32>}, {pipeline_mode = #tpu.pipeline_mode<synchronous>, transform_indices = @transform_2, window_bounds = array<i64: 1, 32>}, {transform_indices = @transform_3, window_bounds = array<i64: 8, 32>}, {transform_indices = @transform_4, window_bounds = array<i64: 8, 32>}, {transform_indices = @transform_5, window_bounds = array<i64: 8, 1>}, {transform_indices = @transform_6, window_bounds = array<i64: 1, 1, 1>}, {transform_indices = @transform_7, window_bounds = array<i64: 1, 1, 1>}]} {
    %c0_i32 = arith.constant 0 : i32
    %0 = arith.cmpi eq, %arg1, %c0_i32 : i32
    %1 = arith.extui %0 : i1 to i32
    %c0_i32_0 = arith.constant 0 : i32
    %2 = arith.cmpi ne, %1, %c0_i32_0 : i32
    scf.if %2 {
      %cst_9 = arith.constant 0.000000e+00 : f32
      %12 = vector.broadcast %cst_9 : f32 to vector<8x32xf32>
      %c0_10 = arith.constant 0 : index
      %c0_11 = arith.constant 0 : index
      %13 = vector.load %arg10[%c0_10, %c0_11] : memref<8x32xf32, #tpu.memory_space<vmem>>, vector<8x32xf32>
      tpu.vector_store %arg10[%c0_10, %c0_11], %12 {strides = array<i32>} : memref<8x32xf32, #tpu.memory_space<vmem>>, vector<8x32xf32>,
      %c0_12 = arith.constant 0 : index
      %c0_13 = arith.constant 0 : index
      %14 = vector.load %arg5[%c0_12, %c0_13] : memref<8x32xf32, #tpu.memory_space<vmem>>, vector<8x32xf32>
      %15 = tpu.iota {dimensions = array<i32: 1>} : vector<8x32xi32>
      %16 = tpu.iota {dimensions = array<i32: 0>} : vector<8x32xi32>
      %c8_i32 = arith.constant 8 : i32
      %17 = arith.muli %arg0, %c8_i32 : i32
      %18 = vector.broadcast %17 : i32 to vector<8x32xi32>
      %19 = arith.addi %16, %18 : vector<8x32xi32>
      %c8_i32_14 = arith.constant 8 : i32
      %20 = vector.broadcast %c8_i32_14 : i32 to vector<8x32xi32>
      %21 = arith.cmpi slt, %19, %20 : vector<8x32xi32>
      %cst_15 = arith.constant dense<0xFF800000> : vector<8xf32>
      %22 = vector.multi_reduction <maximumf>, %14, %cst_15 [1] : vector<8x32xf32> to vector<8xf32>
      %23 = vector.shape_cast %22 : vector<8xf32> to vector<8x1xf32>
      %24 = vector.broadcast %23 : vector<8x1xf32> to vector<8x32xf32>
      %25 = arith.subf %14, %24 : vector<8x32xf32>
      %26 = math.exp %25 : vector<8x32xf32>
      %cst_16 = arith.constant dense<0.000000e+00> : vector<8xf32>
      %27 = vector.multi_reduction <add>, %26, %cst_16 [1] : vector<8x32xf32> to vector<8xf32>
      %28 = vector.shape_cast %27 : vector<8xf32> to vector<8x1xf32>
      %29 = vector.broadcast %23 : vector<8x1xf32> to vector<8x32xf32>
      %30 = arith.subf %14, %29 : vector<8x32xf32>
      %31 = math.log %28 : vector<8x1xf32>
      %32 = vector.broadcast %31 : vector<8x1xf32> to vector<8x32xf32>
      %33 = arith.subf %30, %32 : vector<8x32xf32>
      %c0_17 = arith.constant 0 : index
      %c0_18 = arith.constant 0 : index
      %34 = vector.load %arg7[%c0_17, %c0_18] : memref<8x1xi32, #tpu.memory_space<vmem>>, vector<8x1xi32>
      %35 = vector.broadcast %34 : vector<8x1xi32> to vector<8x32xi32>
      %36 = arith.cmpi eq, %15, %35 : vector<8x32xi32>
      %37 = arith.andi %21, %36 : vector<8x32xi1>
      %cst_19 = arith.constant 0.000000e+00 : f32
      %38 = vector.broadcast %cst_19 : f32 to vector<8x32xf32>
      %39 = arith.select %37, %33, %38 : vector<8x32xi1>, vector<8x32xf32>
      %40 = vector.shape_cast %39 : vector<8x32xf32> to vector<1x8x32xf32>
      %cst_20 = arith.constant dense<0.000000e+00> : vector<1xf32>
      %41 = vector.multi_reduction <add>, %40, %cst_20 [1, 2] : vector<1x8x32xf32> to vector<1xf32>
      %42 = vector.shape_cast %41 : vector<1xf32> to vector<1x1x1xf32>
      %43 = vector.extract %42[0, 0, 0] : f32 from vector<1x1x1xf32>
      %44 = vector.broadcast %43 : f32 to vector<1x1xf32>
      %cst_21 = arith.constant 0.000000e+00 : f32
      %45 = vector.broadcast %cst_21 : f32 to vector<1x1xf32>
      %46 = arith.subf %45, %44 : vector<1x1xf32>
      %47 = vector.shape_cast %46 : vector<1x1xf32> to vector<1x1x1xf32>
      %c0_22 = arith.constant 0 : index
      %c0_23 = arith.constant 0 : index
      %c0_24 = arith.constant 0 : index
      %48 = vector.load %arg8[%c0_22, %c0_23, %c0_24] : memref<1x1x1xf32, #tpu.memory_space<vmem>>, vector<1x1x1xf32>
      tpu.vector_store %arg8[%c0_22, %c0_23, %c0_24], %47 {strides = array<i32>} : memref<1x1x1xf32, #tpu.memory_space<vmem>>, vector<1x1x1xf32>,
    } else {
    }
    %c0 = arith.constant 0 : index
    %c0_1 = arith.constant 0 : index
    %3 = vector.load %arg10[%c0, %c0_1] : memref<8x32xf32, #tpu.memory_space<vmem>>, vector<8x32xf32>
    %c0_2 = arith.constant 0 : index
    %c0_3 = arith.constant 0 : index
    %4 = vector.load %arg2[%c0_2, %c0_3] : memref<8x512xf32, #tpu.memory_space<vmem>>, vector<8x512xf32>
    %c0_4 = arith.constant 0 : index
    %c0_5 = arith.constant 0 : index
    %5 = vector.load %arg3[%c0_4, %c0_5] : memref<512x32xf32, #tpu.memory_space<vmem>>, vector<512x32xf32>
    %cst = arith.constant dense<0.000000e+00> : vector<8x32xf32>
    %6 = tpu.matmul %4, %5, %cst {dimension_numbers = #tpu.dot_dimension_numbers<[1], [0], [0], [1], [0, 0, 1, 1], [], []>} : vector<8x512xf32>, vector<512x32xf32>, vector<8x32xf32> -> vector<8x32xf32>
    %7 = arith.addf %3, %6 : vector<8x32xf32>
    %c0_6 = arith.constant 0 : index
    %c0_7 = arith.constant 0 : index
    %8 = vector.load %arg10[%c0_6, %c0_7] : memref<8x32xf32, #tpu.memory_space<vmem>>, vector<8x32xf32>
    tpu.vector_store %arg10[%c0_6, %c0_7], %7 {strides = array<i32>} : memref<8x32xf32, #tpu.memory_space<vmem>>, vector<8x32xf32>,
    %c1_i32 = arith.constant 1 : i32
    %9 = arith.cmpi eq, %arg1, %c1_i32 : i32
    %10 = arith.extui %9 : i1 to i32
    %c0_i32_8 = arith.constant 0 : i32
    %11 = arith.cmpi ne, %10, %c0_i32_8 : i32
    scf.if %11 {
      %c0_9 = arith.constant 0 : index
      %c0_10 = arith.constant 0 : index
      %12 = vector.load %arg10[%c0_9, %c0_10] : memref<8x32xf32, #tpu.memory_space<vmem>>, vector<8x32xf32>
      %c0_11 = arith.constant 0 : index
      %c0_12 = arith.constant 0 : index
      %13 = vector.load %arg4[%c0_11, %c0_12] : memref<1x32xf32, #tpu.memory_space<vmem>>, vector<1x32xf32>
      %14 = vector.broadcast %13 : vector<1x32xf32> to vector<8x32xf32>
      %15 = arith.addf %12, %14 : vector<8x32xf32>
      %c0_13 = arith.constant 0 : index
      %c0_14 = arith.constant 0 : index
      %16 = vector.load %arg6[%c0_13, %c0_14] : memref<8x32xf32, #tpu.memory_space<vmem>>, vector<8x32xf32>
      %17 = tpu.iota {dimensions = array<i32: 0>} : vector<8x32xi32>
      %c8_i32 = arith.constant 8 : i32
      %18 = arith.muli %arg0, %c8_i32 : i32
      %19 = vector.broadcast %18 : i32 to vector<8x32xi32>
      %20 = arith.addi %17, %19 : vector<8x32xi32>
      %c8_i32_15 = arith.constant 8 : i32
      %21 = vector.broadcast %c8_i32_15 : i32 to vector<8x32xi32>
      %22 = arith.cmpi slt, %20, %21 : vector<8x32xi32>
      %cst_16 = arith.constant 5.000000e-01 : f32
      %23 = vector.broadcast %cst_16 : f32 to vector<8x32xf32>
      %24 = arith.mulf %16, %23 : vector<8x32xf32>
      %cst_17 = arith.constant dense<0xFF800000> : vector<8xf32>
      %25 = vector.multi_reduction <maximumf>, %24, %cst_17 [1] : vector<8x32xf32> to vector<8xf32>
      %26 = vector.shape_cast %25 : vector<8xf32> to vector<8x1xf32>
      %27 = vector.broadcast %26 : vector<8x1xf32> to vector<8x32xf32>
      %28 = arith.subf %24, %27 : vector<8x32xf32>
      %29 = math.exp %28 : vector<8x32xf32>
      %cst_18 = arith.constant dense<0.000000e+00> : vector<8xf32>
      %30 = vector.multi_reduction <add>, %29, %cst_18 [1] : vector<8x32xf32> to vector<8xf32>
      %31 = vector.shape_cast %30 : vector<8xf32> to vector<8x1xf32>
      %32 = vector.broadcast %26 : vector<8x1xf32> to vector<8x32xf32>
      %33 = arith.subf %24, %32 : vector<8x32xf32>
      %34 = math.log %31 : vector<8x1xf32>
      %35 = vector.broadcast %34 : vector<8x1xf32> to vector<8x32xf32>
      %36 = arith.subf %33, %35 : vector<8x32xf32>
      %cst_19 = arith.constant 5.000000e-01 : f32
      %37 = vector.broadcast %cst_19 : f32 to vector<8x32xf32>
      %38 = arith.mulf %15, %37 : vector<8x32xf32>
      %cst_20 = arith.constant dense<0xFF800000> : vector<8xf32>
      %39 = vector.multi_reduction <maximumf>, %38, %cst_20 [1] : vector<8x32xf32> to vector<8xf32>
      %40 = vector.shape_cast %39 : vector<8xf32> to vector<8x1xf32>
      %41 = vector.broadcast %40 : vector<8x1xf32> to vector<8x32xf32>
      %42 = arith.subf %38, %41 : vector<8x32xf32>
      %43 = math.exp %42 : vector<8x32xf32>
      %cst_21 = arith.constant dense<0.000000e+00> : vector<8xf32>
      %44 = vector.multi_reduction <add>, %43, %cst_21 [1] : vector<8x32xf32> to vector<8xf32>
      %45 = vector.shape_cast %44 : vector<8xf32> to vector<8x1xf32>
      %46 = vector.broadcast %40 : vector<8x1xf32> to vector<8x32xf32>
      %47 = arith.subf %38, %46 : vector<8x32xf32>
      %48 = math.log %45 : vector<8x1xf32>
      %49 = vector.broadcast %48 : vector<8x1xf32> to vector<8x32xf32>
      %50 = arith.subf %47, %49 : vector<8x32xf32>
      %51 = tpu.reciprocal %45 {approx = true} : vector<8x1xf32> -> vector<8x1xf32>
      %52 = vector.broadcast %51 : vector<8x1xf32> to vector<8x32xf32>
      %53 = arith.mulf %43, %52 : vector<8x32xf32>
      %54 = arith.subf %50, %36 : vector<8x32xf32>
      %55 = arith.mulf %53, %54 : vector<8x32xf32>
      %cst_22 = arith.constant 0.000000e+00 : f32
      %56 = vector.broadcast %cst_22 : f32 to vector<8x32xf32>
      %57 = arith.select %22, %55, %56 : vector<8x32xi1>, vector<8x32xf32>
      %58 = vector.shape_cast %57 : vector<8x32xf32> to vector<1x8x32xf32>
      %cst_23 = arith.constant dense<0.000000e+00> : vector<1xf32>
      %59 = vector.multi_reduction <add>, %58, %cst_23 [1, 2] : vector<1x8x32xf32> to vector<1xf32>
      %60 = vector.shape_cast %59 : vector<1xf32> to vector<1x1x1xf32>
      %61 = vector.extract %60[0, 0, 0] : f32 from vector<1x1x1xf32>
      %62 = vector.broadcast %61 : f32 to vector<1x1xf32>
      %63 = vector.shape_cast %62 : vector<1x1xf32> to vector<1x1x1xf32>
      %c0_24 = arith.constant 0 : index
      %c0_25 = arith.constant 0 : index
      %c0_26 = arith.constant 0 : index
      %64 = vector.load %arg9[%c0_24, %c0_25, %c0_26] : memref<1x1x1xf32, #tpu.memory_space<vmem>>, vector<1x1x1xf32>
      tpu.vector_store %arg9[%c0_24, %c0_25, %c0_26], %63 {strides = array<i32>} : memref<1x1x1xf32, #tpu.memory_space<vmem>>, vector<1x1x1xf32>,
    } else {
    }
    return
  }
  func.func @transform_0(%arg0: i32, %arg1: i32) -> (i32, i32) {
    %c0_i32 = arith.constant 0 : i32
    return %arg0, %arg1 : i32, i32
  }
  func.func @transform_1(%arg0: i32, %arg1: i32) -> (i32, i32) {
    %c0_i32 = arith.constant 0 : i32
    %c0_i32_0 = arith.constant 0 : i32
    return %arg1, %c0_i32 : i32, i32
  }
  func.func @transform_2(%arg0: i32, %arg1: i32) -> (i32, i32) {
    %c0_i32 = arith.constant 0 : i32
    %c0_i32_0 = arith.constant 0 : i32
    %c0_i32_1 = arith.constant 0 : i32
    return %c0_i32, %c0_i32_0 : i32, i32
  }
  func.func @transform_3(%arg0: i32, %arg1: i32) -> (i32, i32) {
    %c0_i32 = arith.constant 0 : i32
    %c0_i32_0 = arith.constant 0 : i32
    return %arg0, %c0_i32 : i32, i32
  }
  func.func @transform_4(%arg0: i32, %arg1: i32) -> (i32, i32) {
    %c0_i32 = arith.constant 0 : i32
    %c0_i32_0 = arith.constant 0 : i32
    return %arg0, %c0_i32 : i32, i32
  }
  func.func @transform_5(%arg0: i32, %arg1: i32) -> (i32, i32) {
    %c0_i32 = arith.constant 0 : i32
    %c0_i32_0 = arith.constant 0 : i32
    return %arg0, %c0_i32 : i32, i32
  }
  func.func @transform_6(%arg0: i32, %arg1: i32) -> (i32, i32, i32) {
    %c0_i32 = arith.constant 0 : i32
    %c0_i32_0 = arith.constant 0 : i32
    %c0_i32_1 = arith.constant 0 : i32
    return %arg0, %c0_i32, %c0_i32_0 : i32, i32, i32
  }
  func.func @transform_7(%arg0: i32, %arg1: i32) -> (i32, i32, i32) {
    %c0_i32 = arith.constant 0 : i32
    %c0_i32_0 = arith.constant 0 : i32
    %c0_i32_1 = arith.constant 0 : i32
    return %arg0, %c0_i32, %c0_i32_0 : i32, i32, i32
  }
}

</mosaic_0001>

<bundles_post_ra>
// kernel: distillation_loss.1
= control target key start
LH: loop header
LB: loop body
LE: loop exit
PB: predicated region body
PF: predicated region fallthrough
CT: control target
= control target key end

     0   :  { %13 = vsyncpa [#allocation4], 0  ;;  %s1381_s0 = inlined_call_operand.vmem [shape: f32[8,1024], index: 0, kind: input, shape index: {}]   ;;  %s1382_s1 = inlined_call_operand.vmem [shape: f32[1024,32], index: 1, kind: input, shape index: {}]   ;;  %s1383_s2 = inlined_call_operand.vmem [shape: f32[1,32], index: 2, kind: input, shape index: {}]   ;;  %s1384_s3 = inlined_call_operand.vmem [shape: f32[8,32], index: 3, kind: input, shape index: {}]   ;;  %s1385_s4 = inlined_call_operand.vmem [shape: f32[8,32], index: 4, kind: input, shape index: {}]   ;;  %s1386_s5 = inlined_call_operand.vmem [shape: s32[8,1], index: 5, kind: input, shape index: {}]   ;;  %s1387_s6 = inlined_call_operand.hbm [shape: f32[1,1,1], index: 6, kind: output, shape index: {0}]   ;;  %s1388_s7 = inlined_call_operand.hbm [shape: f32[1,1,1], index: 7, kind: output, shape index: {1}]  }
   0x1   :  { %14 = vsyncpa [#allocation6], 0  ;;  %s1189_s24 = smov 0   ;;  %s1191_s25 = smov 0  }
   0x2   :  { %s1193_s26 = smov 0  }
   0x3 LB: > { %s847_s27 = sadd.s32 4294967295, %s1143_s26   ;;  %s29_s28 = sadd.s32 1, %s1139_s25  ;;  %s1143_s26 = sphi %s1193_s26, %s20_s26   ;;  %s1139_s25 = sphi %s1191_s25, %s1391_s25   ;;  %s1135_s24 = sphi %s1189_s24, %s1390_s24  }
   0x4   : > { %p30_p0 = scmp.ge.s32.totalorder %s29_s28, 2  ;;  %p853_p1 = scmp.ge.s32.totalorder %s1143_s26, 1 }
   0x5   : > { %p299_p2 = scmp.lt.s32.totalorder %s1143_s26, 3 }
   0x6   : > { %s1393_s28 = smov (%p30_p0, %s29_s28), 0 }
   0x7   : > { %p300_p3 = pnand %p853_p1, %p299_p2 }
   0x8   : > { %s854_s29 = sshll.u32 (!%p300_p3), %s1135_s24, 2  ;;  %s856_s30 = sshll.u32 (!%p300_p3), %s1135_s24, 6 }
   0x9   : > { %303 = sbr.rel (%p300_p3) target bundleno = 1387 (0x56b), region = 44  ;;  %p350_p4 = scmp.lt.s32.totalorder (!%p300_p3), %s854_s29, 7 }
   0xa   : > { %p358_p5 = scmp.lt.s32.totalorder (!%p300_p3), %s856_s30, 127  ;;  %p858_p6 = scmp.ne.s32.totalorder (!%p300_p3), %s1135_s24, 0 }
  0x10   : > { %s1395_s29 = smov (!%p350_p4, %s854_s29), 7  ;;  %s1397_s30 = smov (!%p358_p5, %s856_s30), 127 }
  0x11   : > { %s855_s8 = sshll.u32 %s1395_s29, 3  ;;  %s857_s12 = sshll.u32 %s1397_s30, 3  ;;  %vm379_vm0 = vcmask (!%p858_p6), 261120   ;;  %v381_v0 = vld [vmem:[%s1384_s3] sm:$0xff] (!%p858_p6)  ;;  %v1145_v2 = vmov (!%p858_p6), 0.0   ;;  %v1146_v4 = vmov (!%p858_p6), 0   ;;  %v382_v11 = vlaneseq (!%p858_p6) }
  0x12   : > { %s1215_s11 = scalar_lea.vmem %s1381_s0, %s855_s8  ;;  %s1220_s15 = scalar_lea.vmem %s1382_s1, %s857_s12  ;;  %v390_v1 = vsel (!%p858_p6), %vm379_vm0, %v381_v0, -inf  ;;  %380 = vst.msk [vmem:[#allocation2] sm:$0xff] (!%p858_p6), %vm379_vm0, %v1145_v2  ;;  %v402_v3 = vld [vmem:[%s1386_s5] sm:$0xff] (!%p858_p6)  ;;  %1045 = vset.pattern.permute.xlu1 (!%p858_p6), %v1146_v4  ;;  %1046 = vset.pattern.permute.xlu0 (!%p858_p6), %v1146_v4  ;;  %vm421_vm2 = vcmask (!%p858_p6), 0  }
  0x13   : > { %378 = sbr.rel (%p858_p6) target bundleno = 544 (0x220), region = 48  ;;  %391 = vmax.xlane.f32.xlu0 (!%p858_p6), %v390_v1  ;;  %404 = vperm.xlu1 (!%p858_p6), %1045, %v402_v3   ;;  %v383_v12 = vand.u32 (!%p858_p6), 127, %v382_v11 }
  0x92   : > { %v405_v13 = vpop.permute.xlu1 %404 }
  0x93   : > { %vm406_vm1 = vcmp.eq.s32.totalorder %v383_v12, %v405_v13 }
  0xa0   : > { %v392_v5 = vpop.xlane.xlu0 %391 }
  0xa1   : > { %v393_v6 = vsub.f32 %v381_v0, %v392_v5 }
  0xa3   : > { %v394_v7 = vmul.f32 1.442695, %v393_v6 }
  0xa5   : > { %1047 = vpow2.f32 %v394_v7 }
  0xaf   : > { %v1048_v8 = vpop.eup %1047 }
  0xb0   : > { %v396_v9 = vsel %vm379_vm0, %v1048_v8, 0.0 }
  0xb1   : > { %397 = vadd.xlane.f32.xlu0 %v396_v9 }
 0x13e   : > { %v398_v10 = vpop.xlane.xlu0 %397 }
 0x13f   : > { %1049 = vlog2.f32 %v398_v10 }
 0x149   : > { %v1050_v14 = vpop.eup %1049 }
 0x14a   : > { %v400_v15 = vmul.f32 0.6931472, %v1050_v14 }
 0x14c   : > { %v401_v16 = vsub.f32 %v393_v6, %v400_v15 }
 0x14e   : > { %v408_v17 = vsel %vm406_vm1, %v401_v16, 0.0 }
 0x14f   : > { %v409_v18 = vsel %vm379_vm0, %v408_v17, 0.0 }
 0x150   : > { %410 = vadd.xlane.f32.xlu1 %v409_v18 }
 0x1dd   : > { %v411_v19 = vpop.xlane.xlu1 %410 }
 0x1de   : > { %v412_v20 = vrot.slane %v411_v19, 4 }
 0x1e0   : > { %v413_v21 = vadd.f32 %v412_v20, %v411_v19 }
 0x1e2   : > { %v414_v22 = vrot.slane %v413_v21, 2 }
 0x1e4   : > { %v415_v23 = vadd.f32 %v414_v22, %v413_v21 }
 0x1e6   : > { %v416_v24 = vrot.slane %v415_v23, 1 }
 0x1e8   : > { %v417_v25 = vadd.f32 %v416_v24, %v415_v23 }
 0x1ea   : > { %1001 = vpush %v417_v25 }
 0x21b   : > { %s1002_s20 = spop %1001 }
 0x21c   : > { %v419_v26 = vstv %s1002_s20 }
 0x21d   : > { %v420_v27 = vsub.f32 0.0, %v419_v26 }
 0x21f   : > { %422 = vst.msk [vmem:[#allocation3] sm:$0x1] %vm421_vm2, %v420_v27 }
 0x220 PF: > { %v444_v28 = vld [vmem:[%s1220_s15 + $0x80] sm:$0xff]  ;;  %v445_v29 = vld [vmem:[%s1220_s15 + $0x88] sm:$0xff]  ;;  %v446_v39 = vld [vmem:[%s1220_s15 + $0x90] sm:$0xff]  ;;  %vm633_vm3 = vcmask 261120   ;;  %p859_p7 = scmp.ne.s32.totalorder %s1135_s24, 1 }
 0x221   : > { %v476_v30 = vld [vmem:[%s1220_s15 + $0x180] sm:$0xff]  ;;  %v937_v31 = vpack.c.bf16 %v445_v29, %v444_v28  ;;  %v477_v32 = vld [vmem:[%s1220_s15 + $0x188] sm:$0xff]  ;;  %v447_v41 = vld [vmem:[%s1220_s15 + $0x98] sm:$0xff]  ;;  %vm697_vm4 = vcmask (!%p859_p7), 0  }
 0x222   : > { %v428_v33 = vld [vmem:[%s1220_s15] sm:$0xff]  ;;  %v429_v34 = vld [vmem:[%s1220_s15 + $0x8] sm:$0xff]  ;;  %v969_v35 = vpack.c.bf16 %v477_v32, %v476_v30  ;;  %v478_v42 = vld [vmem:[%s1220_s15 + $0x190] sm:$0xff]  ;;  %v941_v44 = vpack.c.bf16 %v447_v41, %v446_v39 }
 0x223   : > { %v939_v36 = vpack.c.bf16 %v429_v34, %v428_v33  ;;  %v460_v37 = vld [vmem:[%s1220_s15 + $0x100] sm:$0xff]  ;;  %v461_v38 = vld [vmem:[%s1220_s15 + $0x108] sm:$0xff]  ;;  %938 = vmatprep.subr.bf16.mxu0 %v937_v31  ;;  %v479_v43 = vld [vmem:[%s1220_s15 + $0x198] sm:$0xff] }
 0x224   : > { %v971_v40 = vpack.c.bf16 %v461_v38, %v460_v37  ;;  %970 = vmatprep.subr.bf16.mxu1 %v969_v35  ;;  %v973_v45 = vpack.c.bf16 %v479_v43, %v478_v42  ;;  %v430_v46 = vld [vmem:[%s1220_s15 + $0x10] sm:$0xff]  ;;  %v431_v47 = vld [vmem:[%s1220_s15 + $0x18] sm:$0xff]  ;;  %v448_v51 = vld [vmem:[%s1220_s15 + $0xa0] sm:$0xff] }
 0x225   : > { %940 = vmatpush3.bf16.msra.mxu0 %v939_v36  ;;  %v462_v48 = vld [vmem:[%s1220_s15 + $0x110] sm:$0xff]  ;;  %v943_v49 = vpack.c.bf16 %v431_v47, %v430_v46  ;;  %v463_v50 = vld [vmem:[%s1220_s15 + $0x118] sm:$0xff]  ;;  %v449_v52 = vld [vmem:[%s1220_s15 + $0xa8] sm:$0xff] }
 0x226   : > { %972 = vmatpush3.bf16.msra.mxu1 %v971_v40  ;;  %942 = vmatprep.subr.bf16.mxu0 %v941_v44  ;;  %v975_v53 = vpack.c.bf16 %v463_v50, %v462_v48  ;;  %v945_v54 = vpack.c.bf16 %v449_v52, %v448_v51  ;;  %v480_v55 = vld [vmem:[%s1220_s15 + $0x1a0] sm:$0xff]  ;;  %v481_v56 = vld [vmem:[%s1220_s15 + $0x1a8] sm:$0xff]  ;;  %v450_v63 = vld [vmem:[%s1220_s15 + $0xb0] sm:$0xff] }
 0x227   : > { %974 = vmatprep.subr.bf16.mxu1 %v973_v45  ;;  %v432_v57 = vld [vmem:[%s1220_s15 + $0x20] sm:$0xff]  ;;  %v977_v58 = vpack.c.bf16 %v481_v56, %v480_v55  ;;  %v433_v59 = vld [vmem:[%s1220_s15 + $0x28] sm:$0xff]  ;;  %v451_v0 = vld [vmem:[%s1220_s15 + $0xb8] sm:$0xff] }
 0x228   : > { %v464_v60 = vld [vmem:[%s1220_s15 + $0x120] sm:$0xff]  ;;  %v465_v61 = vld [vmem:[%s1220_s15 + $0x128] sm:$0xff]  ;;  %v947_v62 = vpack.c.bf16 %v433_v59, %v432_v57  ;;  %v482_v1 = vld [vmem:[%s1220_s15 + $0x1b0] sm:$0xff]  ;;  %v949_v3 = vpack.c.bf16 %v451_v0, %v450_v63 }
 0x229   : > { %944 = vmatpush3.bf16.msra.mxu0 %v943_v49  ;;  %v979_v2 = vpack.c.bf16 %v465_v61, %v464_v60  ;;  %v483_v4 = vld [vmem:[%s1220_s15 + $0x1b8] sm:$0xff]  ;;  %v434_v5 = vld [vmem:[%s1220_s15 + $0x30] sm:$0xff]  ;;  %v452_v10 = vld [vmem:[%s1220_s15 + $0xc0] sm:$0xff] }
 0x22a   : > { %976 = vmatpush3.bf16.msra.mxu1 %v975_v53  ;;  %946 = vmatprep.subr.bf16.mxu0 %v945_v54  ;;  %v435_v6 = vld [vmem:[%s1220_s15 + $0x38] sm:$0xff]  ;;  %v981_v7 = vpack.c.bf16 %v483_v4, %v482_v1  ;;  %v466_v8 = vld [vmem:[%s1220_s15 + $0x130] sm:$0xff]  ;;  %v453_v11 = vld [vmem:[%s1220_s15 + $0xc8] sm:$0xff] }
 0x22b   : > { %978 = vmatprep.subr.bf16.mxu1 %v977_v58  ;;  %v467_v9 = vld [vmem:[%s1220_s15 + $0x138] sm:$0xff]  ;;  %v484_v12 = vld [vmem:[%s1220_s15 + $0x1c0] sm:$0xff]  ;;  %v485_v13 = vld [vmem:[%s1220_s15 + $0x1c8] sm:$0xff]  ;;  %v951_v14 = vpack.c.bf16 %v435_v6, %v434_v5  ;;  %v953_v16 = vpack.c.bf16 %v453_v11, %v452_v10 }
 0x22c   : > { %v983_v15 = vpack.c.bf16 %v467_v9, %v466_v8  ;;  %v436_v17 = vld [vmem:[%s1220_s15 + $0x40] sm:$0xff]  ;;  %v437_v18 = vld [vmem:[%s1220_s15 + $0x48] sm:$0xff]  ;;  %v985_v20 = vpack.c.bf16 %v485_v13, %v484_v12  ;;  %v454_v22 = vld [vmem:[%s1220_s15 + $0xd0] sm:$0xff] }
 0x22d   : > { %948 = vmatpush3.bf16.msra.mxu0 %v947_v62  ;;  %v468_v19 = vld [vmem:[%s1220_s15 + $0x140] sm:$0xff]  ;;  %v469_v21 = vld [vmem:[%s1220_s15 + $0x148] sm:$0xff]  ;;  %v455_v23 = vld [vmem:[%s1220_s15 + $0xd8] sm:$0xff]  ;;  %v955_v26 = vpack.c.bf16 %v437_v18, %v436_v17 }
 0x22e   : > { %980 = vmatpush3.bf16.msra.mxu1 %v979_v2  ;;  %950 = vmatprep.subr.bf16.mxu0 %v949_v3  ;;  %v486_v24 = vld [vmem:[%s1220_s15 + $0x1d0] sm:$0xff]  ;;  %v487_v25 = vld [vmem:[%s1220_s15 + $0x1d8] sm:$0xff]  ;;  %v987_v27 = vpack.c.bf16 %v469_v21, %v468_v19  ;;  %v957_v28 = vpack.c.bf16 %v455_v23, %v454_v22  ;;  %v456_v34 = vld [vmem:[%s1220_s15 + $0xe0] sm:$0xff] }
 0x22f   : > { %982 = vmatprep.subr.bf16.mxu1 %v981_v7  ;;  %v438_v29 = vld [vmem:[%s1220_s15 + $0x50] sm:$0xff]  ;;  %v439_v30 = vld [vmem:[%s1220_s15 + $0x58] sm:$0xff]  ;;  %v989_v32 = vpack.c.bf16 %v487_v25, %v486_v24  ;;  %v457_v35 = vld [vmem:[%s1220_s15 + $0xe8] sm:$0xff] }
 0x230   : > { %v470_v31 = vld [vmem:[%s1220_s15 + $0x150] sm:$0xff]  ;;  %v471_v33 = vld [vmem:[%s1220_s15 + $0x158] sm:$0xff]  ;;  %v488_v36 = vld [vmem:[%s1220_s15 + $0x1e0] sm:$0xff]  ;;  %v959_v38 = vpack.c.bf16 %v439_v30, %v438_v29  ;;  %v961_v42 = vpack.c.bf16 %v457_v35, %v456_v34 }
 0x231   : > { %952 = vmatpush3.bf16.msra.mxu0 %v951_v14  ;;  %v489_v37 = vld [vmem:[%s1220_s15 + $0x1e8] sm:$0xff]  ;;  %v440_v39 = vld [vmem:[%s1220_s15 + $0x60] sm:$0xff]  ;;  %v991_v41 = vpack.c.bf16 %v471_v33, %v470_v31  ;;  %v427_v45 = vld [vmem:[%s1215_s11 + $0x18] sm:$0xff] }
 0x232   : > { %984 = vmatpush3.bf16.msra.mxu1 %v983_v15  ;;  %954 = vmatprep.subr.bf16.mxu0 %v953_v16  ;;  %v441_v40 = vld [vmem:[%s1220_s15 + $0x68] sm:$0xff]  ;;  %v472_v43 = vld [vmem:[%s1220_s15 + $0x160] sm:$0xff]  ;;  %v993_v46 = vpack.c.bf16 %v489_v37, %v488_v36  ;;  %v458_v48 = vld [vmem:[%s1220_s15 + $0xf0] sm:$0xff] }
 0x233   : > { %986 = vmatprep.subr.bf16.mxu1 %v985_v20  ;;  %v425_v44 = vld [vmem:[%s1215_s11 + $0x8] sm:$0xff]  ;;  %v459_v49 = vld [vmem:[%s1220_s15 + $0xf8] sm:$0xff]  ;;  %v490_v50 = vld [vmem:[%s1220_s15 + $0x1f0] sm:$0xff]  ;;  %626 = vmatprep.mubr.f32.mxu1 %v427_v45  ;;  %v963_v52 = vpack.c.bf16 %v441_v40, %v440_v39 }
 0x234   : > { %v473_v47 = vld [vmem:[%s1220_s15 + $0x168] sm:$0xff]  ;;  %556 = vmatprep.mubr.f32.mxu0 %v425_v44  ;;  %v491_v51 = vld [vmem:[%s1220_s15 + $0x1f8] sm:$0xff]  ;;  %v965_v54 = vpack.c.bf16 %v459_v49, %v458_v48  ;;  %v442_v55 = vld [vmem:[%s1220_s15 + $0x70] sm:$0xff] }
 0x235   : > { %956 = vmatpush3.bf16.msra.mxu0 %v955_v26  ;;  %v995_v53 = vpack.c.bf16 %v473_v47, %v472_v43  ;;  %v443_v56 = vld [vmem:[%s1220_s15 + $0x78] sm:$0xff]  ;;  %v997_v57 = vpack.c.bf16 %v491_v51, %v490_v50  ;;  %v474_v58 = vld [vmem:[%s1220_s15 + $0x170] sm:$0xff]  ;;  %v424_v62 = vld [vmem:[%s1215_s11] sm:$0xff] }
 0x236   : > { %988 = vmatpush3.bf16.msra.mxu1 %v987_v27  ;;  %958 = vmatprep.subr.bf16.mxu0 %v957_v28  ;;  %v475_v59 = vld [vmem:[%s1220_s15 + $0x178] sm:$0xff]  ;;  %v967_v60 = vpack.c.bf16 %v443_v56, %v442_v55  ;;  %v426_v63 = vld [vmem:[%s1215_s11 + $0x10] sm:$0xff]  ;;  %v423_v6 = vld [vmem:[#allocation2] sm:$0xff] }
 0x237   : > { %990 = vmatprep.subr.bf16.mxu1 %v989_v32  ;;  %v999_v61 = vpack.c.bf16 %v475_v59, %v474_v58  ;;  %v648_v9 = vld [vmem:[%s1385_s4] sm:$0xff] (!%p859_p7) }
 0x238   : > { %v860_v11 = vld [vmem:[%s1383_s2] ss:$0 sm:$0xff] (!%p859_p7)  ;;  %v655_v12 = vmul.f32 (!%p859_p7), 0.5, %v648_v9 }
 0x239   : > { %960 = vmatpush3.bf16.msra.mxu0 %v959_v38 }
 0x23a   : > { %992 = vmatpush3.bf16.msra.mxu1 %v991_v41  ;;  %962 = vmatprep.subr.bf16.mxu0 %v961_v42  ;;  %v656_v14 = vsel (!%p859_p7), %vm633_vm3, %v655_v12, -inf }
 0x23b   : > { %994 = vmatprep.subr.bf16.mxu1 %v993_v46  ;;  %657 = vmax.xlane.f32.xlu0 (!%p859_p7), %v656_v14 }
 0x23d   : > { %964 = vmatpush3.bf16.msra.mxu0 %v963_v52 }
 0x23e   : > { %996 = vmatpush3.bf16.msra.mxu1 %v995_v53  ;;  %966 = vmatprep.subr.bf16.mxu0 %v965_v54 }
 0x23f   : > { %998 = vmatprep.subr.bf16.mxu1 %v997_v57 }
 0x241   : > { %968 = vmatpush3.bf16.msra.mxu0 %v967_v60 }
 0x242   : > { %1000 = vmatpush3.bf16.msra.mxu1 %v999_v61 }
 0x244   : > { %557 = vmatmul.mubr.f32.vlgmr.msra.gmra.mrb[0].mxu0 %v424_v62 }
 0x245   : > { %627 = vmatmul.mubr.f32.vlgmr.msra.gmra.mrb[0].mxu1 %v426_v63 }
 0x2c8   : > { %v658_v17 = vpop.xlane.xlu0 (!%p859_p7), %657 }
 0x2c9   : > { %v659_v18 = vsub.f32 (!%p859_p7), %v655_v12, %v658_v17 }
 0x2cb   : > { %v660_v19 = vmul.f32 (!%p859_p7), 1.442695, %v659_v18 }
 0x2cd   : > { %1051 = vpow2.f32 (!%p859_p7), %v660_v19 }
 0x2d7   : > { %v1052_v23 = vpop.eup (!%p859_p7), %1051 }
 0x2d8   : > { %v662_v24 = vsel (!%p859_p7), %vm633_vm3, %v1052_v23, 0.0 }
 0x2d9   : > { %663 = vadd.xlane.f32.xlu1 (!%p859_p7), %v662_v24 }
 0x317   : > { %v899_v0 = vpop.f32.mrb[0].mxu0 }
 0x318   : > { %v934_v1 = vpop.f32.mrb[0].mxu1  ;;  %v900_v2 = vpop.f32.mrb[1].mxu0 }
 0x319   : > { %v901_v3 = vadd.f32 %v900_v2, %v899_v0  ;;  %v935_v4 = vpop.f32.mrb[1].mxu1 }
 0x31a   : > { %v936_v5 = vadd.f32 %v935_v4, %v934_v1  ;;  %638 = sbr.rel (%p859_p7) target bundleno = 1339 (0x53b), region = 52 }
 0x31c   : > { %v629_v7 = vadd.f32 %v936_v5, %v901_v3 }
 0x31e   : > { %v632_v8 = vadd.f32 %v629_v7, %v423_v6 }
 0x320   : > { %634 = vst.msk [vmem:[#allocation2] sm:$0xff] %vm633_vm3, %v632_v8 }
 0x327   : > { %v639_v10 = vld [vmem:[#allocation2] sm:$0xff] }
 0x328   : > { %v647_v13 = vadd.f32 %v860_v11, %v639_v10 }
 0x32a   : > { %v668_v15 = vmul.f32 0.5, %v647_v13 }
 0x32c   : > { %v669_v16 = vsel %vm633_vm3, %v668_v15, -inf }
 0x32d   : > { %670 = vmax.xlane.f32.xlu0 %v669_v16 }
 0x366   : > { %v664_v27 = vpop.xlane.xlu1 %663 }
 0x3ba   : > { %v671_v20 = vpop.xlane.xlu0 %670 }
 0x3bb   : > { %v672_v21 = vsub.f32 %v668_v15, %v671_v20 }
 0x3bd   : > { %v673_v22 = vmul.f32 1.442695, %v672_v21 }
 0x3bf   : > { %1053 = vpow2.f32 %v673_v22 }
 0x3c0   : > { %1055 = vlog2.f32 %v664_v27 }
 0x3c9   : > { %v1054_v25 = vpop.eup %1053 }
 0x3ca   : > { %v675_v26 = vsel %vm633_vm3, %v1054_v25, 0.0  ;;  %v1056_v29 = vpop.eup %1055 }
 0x3cb   : > { %676 = vadd.xlane.f32.xlu1 %v675_v26  ;;  %v666_v30 = vmul.f32 0.6931472, %v1056_v29 }
 0x3cd   : > { %v667_v34 = vsub.f32 %v659_v18, %v666_v30 }
 0x458   : > { %v677_v28 = vpop.xlane.xlu1 %676 }
 0x459   : > { %1057 = vlog2.f32 %v677_v28 }
 0x45a   : > { %1059 = vrcp.f32 %v677_v28 }
 0x463   : > { %v1058_v31 = vpop.eup %1057 }
 0x464   : > { %v679_v32 = vmul.f32 0.6931472, %v1058_v31  ;;  %v1060_v33 = vpop.eup %1059 }
 0x465   : > { %v682_v36 = vmul.f32 %v1060_v33, %v1054_v25 }
 0x466   : > { %v680_v35 = vsub.f32 %v672_v21, %v679_v32 }
 0x468   : > { %v683_v37 = vsub.f32 %v680_v35, %v667_v34 }
 0x46a   : > { %v684_v38 = vmul.f32 %v683_v37, %v682_v36 }
 0x46c   : > { %v686_v39 = vsel %vm633_vm3, %v684_v38, 0.0 }
 0x46d   : > { %687 = vadd.xlane.f32.xlu0 %v686_v39 }
 0x4fa   : > { %v688_v40 = vpop.xlane.xlu0 %687 }
 0x4fb   : > { %v689_v41 = vrot.slane %v688_v40, 4 }
 0x4fd   : > { %v690_v42 = vadd.f32 %v689_v41, %v688_v40 }
 0x4ff   : > { %v691_v43 = vrot.slane %v690_v42, 2 }
 0x501   : > { %v692_v44 = vadd.f32 %v691_v43, %v690_v42 }
 0x503   : > { %v693_v45 = vrot.slane %v692_v44, 1 }
 0x505   : > { %v694_v46 = vadd.f32 %v693_v45, %v692_v44 }
 0x507   : > { %1003 = vpush %v694_v46 }
 0x538   : > { %s1004_s24 = spop %1003 }
 0x539   : > { %v696_v47 = vstv %s1004_s24 }
 0x53a   : > { %698 = vst.msk [vmem:[#allocation5] sm:$0x1] %vm697_vm4, %v696_v47 }
 0x53b PF: > { %p1316_p8 = scmp.eq.s32.totalorder %s847_s27, 1  ;;  %s1147_s8 = smov [#allocation3]  }
 0x53c   : > { %s708_s9 = sshll.u32 %s1147_s8, 4  ;;  %s1148_s10 = smov [#allocation5]   ;;  %s709_s9 = int_to_ptr.vmem [resolvable:$true] %s708_s9 }
 0x53d   : > { %s721_s11 = sshll.u32 %s1148_s10, 4  ;;  %s1061_s12 = scalar_lea.vmem %s709_s9, 16  ;;  %s1320_s11 = int_to_ptr.vmem [resolvable:$true] %s721_s11 }
 0x53e   : > { %p1062_p9 = scmp.ne.s32.totalorder %s709_s9, %s1061_s12  ;;  %s1067_s13 = scalar_lea.vmem %s709_s9, 32 }
 0x53f   : > { %p1068_p12 = scmp.lt.s32.totalorder %s709_s9, %s709_s9  ;;  %p1069_p13 = scmp.lt.s32.totalorder %s1067_s13, %s1061_s12 }
 0x540   : > { %p1063_p10 = pnand %p1062_p9, %p1316_p8 }
 0x541   : > { %p1070_p0 = por %p1069_p13, %p1068_p12 }
 0x542   : > { %p1064_p11 = pneg %p1063_p10 }
 0x544   : > { %p1071_p1 = pnand %p1070_p0, %p1064_p11 }
 0x546   : > { %1074 = shalt.err (!%p1071_p1)
}
 0x547   : > { %s1075_s15 = scalar_lea.hbm %s1387_s6, 16 }
 0x548   : > { %p1076_p2 = scmp.ne.s32.totalorder %s1387_s6, %s1075_s15  ;;  %p1081_p5 = scmp.lt.u32.totalorder %s1075_s15, %s1387_s6 }
 0x54a   : > { %p1077_p3 = pnand %p1076_p2, %p1316_p8 }
 0x54c   : > { %p1078_p4 = pneg %p1077_p3 }
 0x54e   : > { %p1083_p6 = pnand %p1081_p5, %p1078_p4 }
 0x550   : > { %1086 = shalt.err (!%p1083_p6)
}
 0x551   : > { %1006 = dma.vmem_to_hbm [thread:$0]  (%p1316_p8), %s709_s9, 16, %s1387_s6, [#allocation4]  }
 0x552   : > { %s1087_s22 = scalar_lea.vmem %s1320_s11, 16  ;;  %s1093_s23 = scalar_lea.vmem %s1320_s11, 32 }
 0x553   : > { %p1088_p7 = scmp.ne.s32.totalorder %s1320_s11, %s1087_s22  ;;  %p1094_p11 = scmp.lt.s32.totalorder %s1320_s11, %s1320_s11 }
 0x554   : > { %p1095_p12 = scmp.lt.s32.totalorder %s1093_s23, %s1087_s22 }
 0x555   : > { %p1089_p9 = pnand %p1088_p7, %p1316_p8 }
 0x556   : > { %p1096_p13 = por %p1095_p12, %p1094_p11 }
 0x557   : > { %p1090_p10 = pneg %p1089_p9 }
 0x559   : > { %p1097_p0 = pnand %p1096_p13, %p1090_p10 }
 0x55b   : > { %1100 = shalt.err (!%p1097_p0)
}
 0x55c   : > { %s1101_s8 = scalar_lea.hbm %s1388_s7, 16 }
 0x55d   : > { %p1102_p1 = scmp.ne.s32.totalorder %s1388_s7, %s1101_s8  ;;  %p1107_p4 = scmp.lt.u32.totalorder %s1101_s8, %s1388_s7 }
 0x55f   : > { %p1103_p2 = pnand %p1102_p1, %p1316_p8 }
 0x561   : > { %p1104_p3 = pneg %p1103_p2 }
 0x563   : > { %p1109_p5 = pnand %p1107_p4, %p1104_p3 }
 0x565   : > { %1112 = shalt.err (!%p1109_p5)
}
 0x566   : > { %1008 = dma.vmem_to_hbm [thread:$0]  (%p1316_p8), %s1320_s11, 16, %s1388_s7, [#allocation6]  }
 0x567   : > { %1126 = dma.done.wait (%p1316_p8), [#allocation4], 16  }
 0x568   : > { %1128 = vsyncadd (%p1316_p8), [#allocation4], 4294967280 }
 0x569   : > { %1130 = dma.done.wait (%p1316_p8), [#allocation6], 16  }
 0x56a   : > { %1132 = vsyncadd (%p1316_p8), [#allocation6], 4294967280 }
 0x56b PF: > { %s20_s26 = sadd.s32 1, %s1143_s26   ;;  %s1390_s24 = smov %s1139_s25 }
 0x56c   : > { %p17_p6 = scmp.ge.s32.totalorder %s20_s26, 4   ;;  %s1391_s25 = smov %s1393_s28 }
 0x56e   :  { %19 = sbr.rel (!%p17_p6) target bundleno = 3 (0x3), region = 101 }
 0x575   :  { %738 = vsyncpa [#allocation4], 1 }
 0x576   :  { %740 = vsyncpa [#allocation4 + $0x1], 1 }
 0x577   :  { %741 = vsyncpa [#allocation6], 1 }

</bundles_post_ra>
